<compile_context>
chip_gen: v7x
topology: tpu7x:2x2x1
jax: 0.10.0
libtpu: 0.0.40
codegen_flags: <defaults>
</compile_context>

<pallas_src>
import jax
import jax.numpy as jnp
from jax.experimental import pallas as pl
from jax.experimental.pallas import tpu as pltpu


def _round_up(x, m):
    return (x + m - 1) // m * m


def _select_matmul_kernel(mask_ref, theta_ref, out_ref):
    """Gather columns of a theta row-tile via a single selection matmul.

    mask_ref : VMEM int32 (1, W)        -- all equations' column ids, packed
    theta_ref: VMEM f32   (TILE_N, T)   -- one row tile of theta
    out_ref  : VMEM f32   (TILE_N, W)   -- gathered columns (lane-dense store)
    """
    theta = theta_ref[...]                                     # (TILE_N, T)
    t = theta.shape[1]
    w = out_ref.shape[1]
    # One-hot selection matrix S[r, j] = (r == mask[j]); one iota + one compare.
    row_ids = jax.lax.broadcasted_iota(jnp.int32, (t, w), 0)   # (T, W)
    sel = (row_ids == mask_ref[...]).astype(theta.dtype)       # broadcast (1, W)
    # Single MXU op does the whole gather; single full-tile store.
    out_ref[...] = jnp.dot(
        theta, sel,
        preferred_element_type=jnp.float32,
        precision=jax.lax.Precision.HIGHEST,                   # exact f32 gather
    ).astype(out_ref.dtype)


def apply_mask_pallas(theta, sparsity_masks, *, row_tile=1024):
    """Pallas equivalent of Fitting.apply_mask.

    theta          : (n_samples, n_terms) f32
    sparsity_masks : list of int32 index arrays (lengths may differ per eq.)
    returns        : list of (n_samples, len(mask_i)) arrays
    """
    n_samples, n_terms = theta.shape
    lens = [int(m.shape[0]) for m in sparsity_masks]
    w = sum(lens)
    flat_mask = jnp.concatenate(
        [jnp.asarray(m, dtype=jnp.int32).reshape(-1) for m in sparsity_masks]
    ).reshape(1, w)

    # Row tiling: multiple of 8 sublanes; pad rows so the grid divides evenly.
    tile = _round_up(min(row_tile, n_samples), 8)
    n_pad = _round_up(n_samples, tile)
    theta_p = theta if n_pad == n_samples else jnp.pad(
        theta, ((0, n_pad - n_samples), (0, 0)))

    out = pl.pallas_call(
        _select_matmul_kernel,
        out_shape=jax.ShapeDtypeStruct((n_pad, w), theta.dtype),
        grid=(n_pad // tile,),
        in_specs=[
            # packed mask: same (full) block every step
            pl.BlockSpec((1, w), lambda i: (0, 0)),
            # one row tile of theta per step
            pl.BlockSpec((tile, n_terms), lambda i: (i, 0)),
        ],
        out_specs=pl.BlockSpec((tile, w), lambda i: (i, 0)),
        compiler_params=pltpu.CompilerParams(
            dimension_semantics=("parallel",)),   # row tiles are independent
    )(flat_mask, theta_p)

    out = out[:n_samples]
    # Split the packed lanes back into per-equation arrays.
    sparse_theta = []
    off = 0
    for n_sel in lens:
        sparse_theta.append(out[:, off:off + n_sel])
        off += n_sel
    return sparse_theta


class FittingPallas:
    """JAX/Pallas port of deepymod_torch.network.Fitting."""

    def __init__(self, n_equations, n_terms, library_config, key):
        keys = jax.random.split(key, n_equations)
        tensor_list = [
            jax.random.uniform(k, (n_terms, 1), dtype=jnp.float32) for k in keys
        ]  # torch.rand equivalent
        if "coeff_sign" in library_config:
            sign = library_config["coeff_sign"]
            tensor_list = [sign * jnp.abs(t) for t in tensor_list]
        self.coeff_vector = tensor_list
        self.sparsity_mask = [
            jnp.arange(n_terms, dtype=jnp.int32) for _ in range(n_equations)
        ]
        self.coeff_vector_history = []
        self.sparsity_mask_history = []

    def forward(self, theta):
        sparse_theta = apply_mask_pallas(theta, self.sparsity_mask)
        return sparse_theta, self.coeff_vector

    __call__ = forward


if __name__ == "__main__":
    key = jax.random.PRNGKey(0)
    k_theta, k_params, k_big = jax.random.split(key, 3)

    # --- Module-level check (full arange masks, single row tile, padding path)
    n_samples, n_terms, n_equations = 300, 8, 2
    theta = jax.random.normal(k_theta, (n_samples, n_terms), dtype=jnp.float32)

    module = FittingPallas(
        n_equations, n_terms, library_config={"coeff_sign": 1.0}, key=k_params
    )
    sparse_theta, coeff_vector = module(theta)
    sparse_theta = [jax.block_until_ready(s) for s in sparse_theta]
    coeff_vector = [jax.block_until_ready(c) for c in coeff_vector]

    for s, m in zip(sparse_theta, module.sparsity_mask):
        ref = jnp.take(theta, m, axis=1)
        assert s.shape == (n_samples, int(m.shape[0]))
        assert jnp.allclose(s, ref, atol=1e-6), "mismatch vs reference gather"
    for c in coeff_vector:
        assert c.shape == (n_terms, 1)
        assert bool(jnp.all(c >= 0)), "coeff_sign init violated"

    # --- Ragged masks + multi-tile grid check (post-thresholding scenario)
    theta_big = jax.random.normal(k_big, (1024, n_terms), dtype=jnp.float32)
    ragged_masks = [
        jnp.array([0, 2, 5], dtype=jnp.int32),
        jnp.array([1, 3, 4, 6, 7], dtype=jnp.int32),
        jnp.array([7], dtype=jnp.int32),
    ]
    sparse_big = apply_mask_pallas(theta_big, ragged_masks, row_tile=256)
    sparse_big = [jax.block_until_ready(s) for s in sparse_big]
    for s, m in zip(sparse_big, ragged_masks):
        ref = jnp.take(theta_big, m, axis=1)
        assert s.shape == (theta_big.shape[0], int(m.shape[0]))
        assert jnp.allclose(s, ref, atol=1e-6), "ragged-mask mismatch"

    print("KERNEL_OK")
</pallas_src>

<mosaic_0001>
module attributes {stable_mosaic.version = 11 : i64} {
  func.func @_select_matmul_kernel(%arg0: i32, %arg1: memref<1x16xi32, #tpu.memory_space<vmem>>, %arg2: memref<304x8xf32, #tpu.memory_space<vmem>>, %arg3: memref<304x16xf32, #tpu.memory_space<vmem>>) attributes {dimension_semantics = [#tpu.dimension_semantics<parallel>], iteration_bounds = array<i64: 1>, scalar_prefetch = 0 : i64, scratch_operands = 0 : i64, tpu.core_type = #tpu.core_type<tc>, window_params = [{pipeline_mode = #tpu.pipeline_mode<synchronous>, transform_indices = @transform_0, window_bounds = array<i64: 1, 16>}, {transform_indices = @transform_1, window_bounds = array<i64: 304, 8>}, {transform_indices = @transform_2, window_bounds = array<i64: 304, 16>}]} {
    %c0 = arith.constant 0 : index
    %c0_0 = arith.constant 0 : index
    %0 = vector.load %arg2[%c0, %c0_0] : memref<304x8xf32, #tpu.memory_space<vmem>>, vector<304x8xf32>
    %1 = tpu.iota {dimensions = array<i32: 0>} : vector<8x16xi32>
    %c0_1 = arith.constant 0 : index
    %c0_2 = arith.constant 0 : index
    %2 = vector.load %arg1[%c0_1, %c0_2] : memref<1x16xi32, #tpu.memory_space<vmem>>, vector<1x16xi32>
    %3 = vector.broadcast %2 : vector<1x16xi32> to vector<8x16xi32>
    %4 = arith.cmpi eq, %1, %3 : vector<8x16xi32>
    %5 = arith.extui %4 : vector<8x16xi1> to vector<8x16xi32>
    %6 = arith.sitofp %5 : vector<8x16xi32> to vector<8x16xf32>
    %cst = arith.constant dense<0.000000e+00> : vector<304x16xf32>
    %7 = tpu.matmul %0, %6, %cst {dimension_numbers = #tpu.dot_dimension_numbers<[1], [0], [0], [1], [0, 0, 1, 1], [], []>, precision = #tpu.contract_precision<fp32>} : vector<304x8xf32>, vector<8x16xf32>, vector<304x16xf32> -> vector<304x16xf32>
    %c0_3 = arith.constant 0 : index
    %c0_4 = arith.constant 0 : index
    %8 = vector.load %arg3[%c0_3, %c0_4] : memref<304x16xf32, #tpu.memory_space<vmem>>, vector<304x16xf32>
    tpu.vector_store %arg3[%c0_3, %c0_4], %7 {strides = array<i32>} : memref<304x16xf32, #tpu.memory_space<vmem>>, vector<304x16xf32>,
    return
  }
  func.func @transform_0(%arg0: i32) -> (i32, i32) {
    %c0_i32 = arith.constant 0 : i32
    %c0_i32_0 = arith.constant 0 : i32
    %c0_i32_1 = arith.constant 0 : i32
    return %c0_i32, %c0_i32_0 : i32, i32
  }
  func.func @transform_1(%arg0: i32) -> (i32, i32) {
    %c0_i32 = arith.constant 0 : i32
    %c0_i32_0 = arith.constant 0 : i32
    return %arg0, %c0_i32 : i32, i32
  }
  func.func @transform_2(%arg0: i32) -> (i32, i32) {
    %c0_i32 = arith.constant 0 : i32
    %c0_i32_0 = arith.constant 0 : i32
    return %arg0, %c0_i32 : i32, i32
  }
}

</mosaic_0001>

<bundles_post_ra>
// kernel: tpu_custom_call.1
= control target key start
LH: loop header
LB: loop body
LE: loop exit
PB: predicated region body
PF: predicated region fallthrough
CT: control target
= control target key end

     0   :  { %v49_v0 = vlaneseq  ;;  %vm59_vm0 = vcmask 64512   ;;  %v3814_v19 = vmov 1.0   ;;  %v3040_v22 = vmov 0.0   ;;  %s3811_s0 = inlined_call_operand.vmem [shape: s32[1,16], index: 0, kind: input, shape index: {}]   ;;  %s3812_s1 = inlined_call_operand.vmem [shape: f32[304,8], index: 1, kind: input, shape index: {}]   ;;  %s3813_s2 = inlined_call_operand.vmem [shape: f32[304,16], index: 2, kind: output, shape index: {}]  }
   0x1   :  { %v2254_v1 = vld [vmem:[%s3811_s0] ss:$0 sm:$0xff]  ;;  %v12_v3 = vld [vmem:[%s3812_s1 + $0x8] sm:$0xff]  ;;  %v13_v7 = vld [vmem:[%s3812_s1 + $0x10] sm:$0xff]  ;;  %vm2211_vm2 = vcmask 130048  }
   0x2   :  { %v11_v2 = vld [vmem:[%s3812_s1] sm:$0xff]  ;;  %v50_v4 = vshrl.u32 %v49_v0, 7  ;;  %v64_v6 = vsel %vm59_vm0, %v12_v3, 0  ;;  %v14_v8 = vld [vmem:[%s3812_s1 + $0x18] sm:$0xff]  ;;  %v67_v12 = vsel %vm59_vm0, %v13_v7, 0  ;;  %v16_v14 = vld [vmem:[%s3812_s1 + $0x28] sm:$0xff] }
   0x3   :  { %v61_v5 = vsel %vm59_vm0, %v11_v2, 0  ;;  %v15_v9 = vld [vmem:[%s3812_s1 + $0x20] sm:$0xff]  ;;  %v3078_v11 = vand.u32 4294901760, %v64_v6  ;;  %v70_v13 = vsel %vm59_vm0, %v14_v8, 0  ;;  %v3089_v16 = vand.u32 4294901760, %v67_v12  ;;  %v17_v25 = vld [vmem:[%s3812_s1 + $0x30] sm:$0xff] }
   0x4   :  { %v3076_v10 = vand.u32 4294901760, %v61_v5  ;;  %vm3085_vm1 = vcmp.eq.s32.totalorder %v50_v4, %v2254_v1  ;;  %v3091_v17 = vand.u32 4294901760, %v70_v13  ;;  %v73_v18 = vsel %vm59_vm0, %v15_v9, 0  ;;  %v18_v46 = vld [vmem:[%s3812_s1 + $0x38] sm:$0xff]  ;;  %v19_v47 = vld [vmem:[%s3812_s1 + $0x40] sm:$0xff]  ;;  %v20_v52 = vld [vmem:[%s3812_s1 + $0x48] sm:$0xff] }
   0x5   :  { %2670 = vmatprep.subr.msk.mxu0 %vm3085_vm1, %v3814_v19  ;;  %v3101_v21 = vsub.f32 %v64_v6, %v3078_v11  ;;  %2493 = vmatprep.subr.msk.mxu1 %vm3085_vm1, %v3814_v19  ;;  %v2255_v23 = vsel %vm3085_vm1, 1.0, %v3040_v22  ;;  %v3108_v24 = vand.u32 4294901760, %v73_v18  ;;  %v3120_v26 = vsub.f32 %v67_v12, %v3089_v16  ;;  %v21_v57 = vld [vmem:[%s3812_s1 + $0x50] sm:$0xff]  ;;  %v22_v58 = vld [vmem:[%s3812_s1 + $0x58] sm:$0xff]  ;;  %v23_v3 = vld [vmem:[%s3812_s1 + $0x60] sm:$0xff] }
   0x6   :  { %v3098_v20 = vsub.f32 %v61_v5, %v3076_v10  ;;  %2671 = vmatpush3.msk.msra.mxu0 %vm3085_vm1, %v3814_v19  ;;  %2494 = vmatpush3.msk.msra.mxu1 %vm3085_vm1, %v3814_v19  ;;  %v3122_v27 = vsub.f32 %v2255_v23, %v2255_v23  ;;  %v3125_v28 = vsub.f32 %v70_v13, %v3091_v17  ;;  %v76_v29 = vsel %vm59_vm0, %v16_v14, 0  ;;  %v24_v4 = vld [vmem:[%s3812_s1 + $0x68] sm:$0xff] }
   0x7   :  { %3849 = vst [vmem:[#allocation3_spill] sm:$0xff] %v3101_v21  ;;  %3850 = vst [vmem:[#allocation4_spill] sm:$0xff] %v3120_v26  ;;  %v252_v31 = vand.u32 4294901760, %v3101_v21  ;;  %v3131_v32 = vsub.f32 %v73_v18, %v3108_v24  ;;  %v3133_v33 = vand.u32 4294901760, %v76_v29  ;;  %v262_v34 = vand.u32 4294901760, %v3120_v26 }
   0x8   :  { %3848 = vst [vmem:[#allocation2_spill] sm:$0xff] %v3098_v20  ;;  %3851 = vst [vmem:[#allocation5_spill] sm:$0xff] %v3125_v28  ;;  %v242_v30 = vand.u32 4294901760, %v3098_v20  ;;  %v623_v35 = vand.u32 4294901760, %v3122_v27  ;;  %v272_v36 = vand.u32 4294901760, %v3125_v28  ;;  %v79_v37 = vsel %vm59_vm0, %v17_v25, 0 }
   0x9   :  { %3852 = vst [vmem:[#allocation6_spill] sm:$0xff] %v3131_v32  ;;  %v253_v39 = vsub.f32 %v3101_v21, %v252_v31  ;;  %v282_v40 = vand.u32 4294901760, %v3131_v32  ;;  %v3143_v41 = vsub.f32 %v76_v29, %v3133_v33  ;;  %v263_v43 = vsub.f32 %v3120_v26, %v262_v34  ;;  %v25_v29 = vld [vmem:[%s3812_s1 + $0x70] sm:$0xff] }
   0xa   :  { %2672 = vmatprep.mubr.f32.mxu0 %v242_v30  ;;  %v243_v38 = vsub.f32 %v3098_v20, %v242_v30  ;;  %v624_v42 = vsub.f32 %v3122_v27, %v623_v35  ;;  %2729 = vmatprep.subr.mxu0 %v623_v35  ;;  %v273_v44 = vsub.f32 %v3125_v28, %v272_v36  ;;  %v3148_v45 = vand.u32 4294901760, %v79_v37 }
   0xb   :  { %3853 = vst [vmem:[#allocation7_spill] sm:$0xff] %v3143_v41  ;;  %2673 = vmatmul.mubr.f32.vlgmr.msra.gmra.mrb[0].mxu0 %v252_v31  ;;  %v254_v49 = vand.u32 4294901760, %v253_v39  ;;  %v292_v50 = vand.u32 4294901760, %v3143_v41  ;;  %v283_v51 = vsub.f32 %v3131_v32, %v282_v40  ;;  %v264_v54 = vand.u32 4294901760, %v263_v43 }
   0xc   :  { %v244_v48 = vand.u32 4294901760, %v243_v38  ;;  %2675 = vmatprep.mubr.f32.mxu0 %v262_v34  ;;  %2730 = vmatpush3.msra.mxu0 %v623_v35  ;;  %v625_v53 = vand.u32 4294901760, %v624_v42  ;;  %v274_v55 = vand.u32 4294901760, %v273_v44  ;;  %v3162_v56 = vsub.f32 %v79_v37, %v3148_v45 }
   0xd   :  { %2788 = vmatprep.subr.msk.mxu0 %vm3085_vm1, %v3814_v19  ;;  %v284_v59 = vand.u32 4294901760, %v283_v51  ;;  %v293_v60 = vsub.f32 %v3143_v41, %v292_v50  ;;  %v82_v61 = vsel %vm59_vm0, %v18_v46, 0  ;;  %v85_v62 = vsel %vm59_vm0, %v19_v47, 0  ;;  %v27_v51 = vld [vmem:[%s3812_s1 + $0x80] sm:$0xff] }
   0xe   :  { %3854 = vst [vmem:[#allocation8_spill] sm:$0xff] %v3162_v56  ;;  %2495 = vmatprep.mubr.f32.mxu1 %v244_v48  ;;  %2552 = vmatprep.subr.mxu1 %v625_v53  ;;  %v302_v63 = vand.u32 4294901760, %v3162_v56  ;;  %v3177_v0 = vand.u32 4294901760, %v82_v61  ;;  %v3179_v1 = vand.u32 4294901760, %v85_v62  ;;  %v88_v2 = vsel %vm59_vm0, %v20_v52, 0 }
   0xf   :  { %2496 = vmatmul.mubr.f32.vlgmr.msra.gmra.mrb[0].mxu1 %v254_v49  ;;  %2676 = vmatmul.mubr.f32.gmra.mrb[2].mxu0 %v272_v36  ;;  %v294_v5 = vand.u32 4294901760, %v293_v60  ;;  %v3188_v6 = vand.u32 4294901760, %v88_v2  ;;  %v91_v7 = vsel %vm59_vm0, %v21_v57, 0  ;;  %v94_v8 = vsel %vm59_vm0, %v22_v58, 0  ;;  %v28_v58 = vld [vmem:[%s3812_s1 + $0x88] sm:$0xff]  ;;  %v3880_v15 = vld [vmem:[#allocation2_spill] sm:$0xff] }
  0x10   :  { %2553 = vmatpush3.msra.mxu1 %v625_v53  ;;  %2498 = vmatprep.mubr.f32.mxu1 %v264_v54  ;;  %v3193_v9 = vsub.f32 %v82_v61, %v3177_v0  ;;  %v303_v12 = vsub.f32 %v3162_v56, %v302_v63  ;;  %v3197_v13 = vsub.f32 %v85_v62, %v3179_v1  ;;  %v3199_v14 = vand.u32 4294901760, %v91_v7 }
  0x11   :  { %2678 = vmatprep.mubr.f32.mxu0 %v282_v40  ;;  %v3202_v18 = vsub.f32 %v88_v2, %v3188_v6  ;;  %v3204_v22 = vand.u32 4294901760, %v94_v8  ;;  %v97_v23 = vsel %vm59_vm0, %v23_v3, 0  ;;  %v100_v25 = vsel %vm59_vm0, %v24_v4, 0  ;;  %2611 = vmatprep.subr.mxu1 %v3122_v27 }
  0x12   :  { %3855 = vst [vmem:[#allocation9_spill] sm:$0xff] %v3193_v9  ;;  %3856 = vst [vmem:[#allocation10_spill] sm:$0xff] %v3197_v13  ;;  %v312_v30 = vand.u32 4294901760, %v3193_v9  ;;  %v304_v31 = vand.u32 4294901760, %v303_v12  ;;  %v322_v34 = vand.u32 4294901760, %v3197_v13  ;;  %v3215_v35 = vsub.f32 %v91_v7, %v3199_v14 }
  0x13   :  { %3857 = vst [vmem:[#allocation11_spill] sm:$0xff] %v3202_v18  ;;  %2499 = vmatmul.mubr.f32.gmra.mrb[2].mxu1 %v274_v55  ;;  %2679 = vmatmul.mubr.f32.gmra.mrb[4].mxu0 %v292_v50  ;;  %v332_v36 = vand.u32 4294901760, %v3202_v18  ;;  %v3219_v37 = vsub.f32 %v94_v8, %v3204_v22  ;;  %v3221_v38 = vand.u32 4294901760, %v97_v23  ;;  %v3223_v39 = vand.u32 4294901760, %v100_v25  ;;  %v26_v50 = vld [vmem:[%s3812_s1 + $0x78] sm:$0xff] }
  0x14   :  { %3858 = vst [vmem:[#allocation12_spill] sm:$0xff] %v3215_v35  ;;  %2501 = vmatprep.mubr.f32.mxu1 %v284_v59  ;;  %2681 = vmatprep.mubr.f32.mxu0 %v302_v63  ;;  %v313_v40 = vsub.f32 %v3193_v9, %v312_v30  ;;  %v323_v42 = vsub.f32 %v3197_v13, %v322_v34  ;;  %v342_v43 = vand.u32 4294901760, %v3215_v35  ;;  %v103_v44 = vsel %vm59_vm0, %v25_v29, 0  ;;  %v29_v59 = vld [vmem:[%s3812_s1 + $0x90] sm:$0xff]  ;;  %v40_v13 = vld [vmem:[%s3812_s1 + $0xe8] sm:$0xff] }
  0x15   :  { %3859 = vst [vmem:[#allocation13_spill] sm:$0xff] %v3219_v37  ;;  %v333_v46 = vsub.f32 %v3202_v18, %v332_v36  ;;  %v352_v47 = vand.u32 4294901760, %v3219_v37  ;;  %v3232_v48 = vsub.f32 %v97_v23, %v3221_v38  ;;  %v3235_v49 = vsub.f32 %v100_v25, %v3223_v39  ;;  %v31_v25 = vld [vmem:[%s3812_s1 + $0xa0] sm:$0xff] }
  0x16   :  { %v314_v52 = vand.u32 4294901760, %v313_v40  ;;  %v3243_v53 = vand.u32 4294901760, %v103_v44  ;;  %v324_v54 = vand.u32 4294901760, %v323_v42  ;;  %v343_v55 = vsub.f32 %v3215_v35, %v342_v43 }
  0x17   :  { %3860 = vst [vmem:[#allocation14_spill] sm:$0xff] %v3232_v48  ;;  %3861 = vst [vmem:[#allocation15_spill] sm:$0xff] %v3235_v49  ;;  %2502 = vmatmul.mubr.f32.gmra.mrb[4].mxu1 %v294_v5  ;;  %2682 = vmatmul.mubr.f32.gmra.mrb[6].mxu0 %v312_v30  ;;  %v362_v57 = vand.u32 4294901760, %v3232_v48  ;;  %v106_v61 = vsel %vm59_vm0, %v26_v50, 0  ;;  %v109_v62 = vsel %vm59_vm0, %v27_v51, 0  ;;  %v334_v63 = vand.u32 4294901760, %v333_v46 }
  0x18   :  { %2504 = vmatprep.mubr.f32.mxu1 %v304_v31  ;;  %2684 = vmatprep.mubr.f32.mxu0 %v322_v34  ;;  %v3254_v60 = vsub.f32 %v103_v44, %v3243_v53  ;;  %v353_v2 = vsub.f32 %v3219_v37, %v352_v47  ;;  %v372_v3 = vand.u32 4294901760, %v3235_v49  ;;  %v3260_v4 = vand.u32 4294901760, %v106_v61  ;;  %v30_v5 = vld [vmem:[%s3812_s1 + $0x98] sm:$0xff] }
  0x19   :  { %v3266_v8 = vand.u32 4294901760, %v109_v62  ;;  %v112_v12 = vsel %vm59_vm0, %v28_v58, 0  ;;  %v115_v23 = vsel %vm59_vm0, %v29_v59, 0  ;;  %v344_v29 = vand.u32 4294901760, %v343_v55  ;;  %v33_v59 = vld [vmem:[%s3812_s1 + $0xb0] sm:$0xff] }
  0x1a   :  { %3862 = vst [vmem:[#allocation16_spill] sm:$0xff] %v3254_v60  ;;  %v382_v7 = vand.u32 4294901760, %v3254_v60  ;;  %v363_v30 = vsub.f32 %v3232_v48, %v362_v57  ;;  %v3275_v31 = vsub.f32 %v106_v61, %v3260_v4  ;;  %v3277_v34 = vand.u32 4294901760, %v112_v12 }
  0x1b   :  { %2505 = vmatmul.mubr.f32.gmra.mrb[6].mxu1 %v314_v52  ;;  %2685 = vmatmul.mubr.f32.gmra.mrb[8].mxu0 %v332_v36  ;;  %v3280_v40 = vsub.f32 %v109_v62, %v3266_v8  ;;  %v3282_v42 = vand.u32 4294901760, %v115_v23  ;;  %v118_v44 = vsel %vm59_vm0, %v30_v5, 0  ;;  %v32_v36 = vld [vmem:[%s3812_s1 + $0xa8] sm:$0xff]  ;;  %v354_v46 = vand.u32 4294901760, %v353_v2 }
  0x1c   :  { %2507 = vmatprep.mubr.f32.mxu1 %v324_v54  ;;  %3863 = vst [vmem:[#allocation17_spill] sm:$0xff] %v3275_v31  ;;  %2687 = vmatprep.mubr.f32.mxu0 %v342_v43  ;;  %v373_v50 = vsub.f32 %v3235_v49, %v372_v3  ;;  %v3289_v51 = vand.u32 4294901760, %v118_v44  ;;  %v121_v52 = vsel %vm59_vm0, %v31_v25, 0  ;;  %v392_v43 = vand.u32 4294901760, %v3275_v31 }
  0x1d   :  { %3864 = vst [vmem:[#allocation18_spill] sm:$0xff] %v3280_v40  ;;  %v383_v54 = vsub.f32 %v3254_v60, %v382_v7  ;;  %v402_v55 = vand.u32 4294901760, %v3280_v40  ;;  %v3296_v58 = vsub.f32 %v112_v12, %v3277_v34  ;;  %v364_v61 = vand.u32 4294901760, %v363_v30  ;;  %v34_v12 = vld [vmem:[%s3812_s1 + $0xb8] sm:$0xff] }
  0x1e   :  { %v3302_v62 = vsub.f32 %v115_v23, %v3282_v42  ;;  %v124_v2 = vsel %vm59_vm0, %v32_v36, 0  ;;  %v374_v25 = vand.u32 4294901760, %v373_v50  ;;  %v3313_v19 = vsub.f32 %v118_v44, %v3289_v51  ;;  %v35_v36 = vld [vmem:[%s3812_s1 + $0xc0] sm:$0xff] }
  0x1f   :  { %2508 = vmatmul.mubr.f32.gmra.mrb[8].mxu1 %v334_v63  ;;  %3865 = vst [vmem:[#allocation19_spill] sm:$0xff] %v3296_v58  ;;  %2688 = vmatmul.mubr.f32.gmra.mrb[10].mxu0 %v352_v47  ;;  %v3304_v63 = vand.u32 4294901760, %v121_v52  ;;  %v3307_v5 = vand.u32 4294901760, %v124_v2  ;;  %v127_v47 = vsel %vm59_vm0, %v33_v59, 0  ;;  %v384_v23 = vand.u32 4294901760, %v383_v54  ;;  %v36_v54 = vld [vmem:[%s3812_s1 + $0xc8] sm:$0xff] }
  0x20   :  { %2510 = vmatprep.mubr.f32.mxu1 %v344_v29  ;;  %3866 = vst [vmem:[#allocation20_spill] sm:$0xff] %v3302_v62  ;;  %2690 = vmatprep.mubr.f32.mxu0 %v362_v57  ;;  %3867 = vst [vmem:[#allocation21_spill] sm:$0xff] %v3313_v19  ;;  %v393_v29 = vsub.f32 %v3275_v31, %v392_v43  ;;  %v412_v30 = vand.u32 4294901760, %v3296_v58  ;;  %v403_v57 = vsub.f32 %v3280_v40, %v402_v55 }
  0x21   :  { %v422_v50 = vand.u32 4294901760, %v3302_v62  ;;  %v3324_v44 = vsub.f32 %v121_v52, %v3304_v63  ;;  %v3326_v59 = vand.u32 4294901760, %v127_v47  ;;  %v3333_v40 = vsub.f32 %v124_v2, %v3307_v5 }
  0x22   :  { %v432_v52 = vand.u32 4294901760, %v3313_v19  ;;  %v394_v60 = vand.u32 4294901760, %v393_v29  ;;  %v136_v2 = vsel %vm59_vm0, %v36_v54, 0  ;;  %v404_v48 = vand.u32 4294901760, %v403_v57 }
  0x23   :  { %2511 = vmatmul.mubr.f32.gmra.mrb[10].mxu1 %v354_v46  ;;  %2691 = vmatmul.mubr.f32.gmra.mrb[12].mxu0 %v372_v3  ;;  %3868 = vst [vmem:[#allocation22_spill] sm:$0xff] %v3324_v44  ;;  %v130_v46 = vsel %vm59_vm0, %v34_v12, 0  ;;  %3869 = vst [vmem:[#allocation23_spill] sm:$0xff] %v3333_v40  ;;  %v37_v3 = vld [vmem:[%s3812_s1 + $0xd0] sm:$0xff]  ;;  %v133_v12 = vsel %vm59_vm0, %v35_v36, 0  ;;  %v423_v37 = vsub.f32 %v3302_v62, %v422_v50  ;;  %v442_v35 = vand.u32 4294901760, %v3324_v44 }
  0x24   :  { %2513 = vmatprep.mubr.f32.mxu1 %v364_v61  ;;  %2693 = vmatprep.mubr.f32.mxu0 %v382_v7  ;;  %v3335_v31 = vand.u32 4294901760, %v130_v46  ;;  %v3342_v61 = vsub.f32 %v127_v47, %v3326_v59  ;;  %v413_v7 = vsub.f32 %v3296_v58, %v412_v30  ;;  %v3346_v49 = vand.u32 4294901760, %v133_v12 }
  0x25   :  { %v139_v47 = vsel %vm59_vm0, %v37_v3, 0  ;;  %v452_v29 = vand.u32 4294901760, %v3333_v40  ;;  %v3364_v54 = vand.u32 4294901760, %v136_v2  ;;  %v424_v58 = vand.u32 4294901760, %v423_v37 }
  0x26   :  { %3870 = vst [vmem:[#allocation24_spill] sm:$0xff] %v3342_v61  ;;  %v3357_v36 = vsub.f32 %v130_v46, %v3335_v31  ;;  %v462_v57 = vand.u32 4294901760, %v3342_v61  ;;  %v414_v3 = vand.u32 4294901760, %v413_v7  ;;  %v3367_v62 = vsub.f32 %v133_v12, %v3346_v49 }
  0x27   :  { %2514 = vmatmul.mubr.f32.gmra.mrb[12].mxu1 %v374_v25  ;;  %2694 = vmatmul.mubr.f32.gmra.mrb[14].mxu0 %v392_v43  ;;  %v38_v25 = vld [vmem:[%s3812_s1 + $0xd8] sm:$0xff]  ;;  %v39_v43 = vld [vmem:[%s3812_s1 + $0xe0] sm:$0xff]  ;;  %v443_v18 = vsub.f32 %v3324_v44, %v442_v35 }
  0x28   :  { %2516 = vmatprep.mubr.f32.mxu1 %v384_v23  ;;  %2696 = vmatprep.mubr.f32.mxu0 %v402_v55  ;;  %3871 = vst [vmem:[#allocation25_spill] sm:$0xff] %v3357_v36  ;;  %v433_v23 = vsub.f32 %v3313_v19, %v432_v52  ;;  %3872 = vst [vmem:[#allocation26_spill] sm:$0xff] %v3367_v62  ;;  %v3369_v55 = vand.u32 4294901760, %v139_v47  ;;  %v142_v46 = vsel %vm59_vm0, %v38_v25, 0  ;;  %v145_v19 = vsel %vm59_vm0, %v39_v43, 0 }
  0x29   :  { %v472_v12 = vand.u32 4294901760, %v3357_v36  ;;  %v463_v9 = vsub.f32 %v3342_v61, %v462_v57  ;;  %v3383_v37 = vand.u32 4294901760, %v142_v46  ;;  %v482_v25 = vand.u32 4294901760, %v3367_v62 }
  0x2a   :  { %v434_v7 = vand.u32 4294901760, %v433_v23  ;;  %v3392_v43 = vand.u32 4294901760, %v145_v19  ;;  %v148_v23 = vsel %vm59_vm0, %v40_v13, 0  ;;  %v444_v61 = vand.u32 4294901760, %v443_v18  ;;  %v45_v13 = vld [vmem:[%s3812_s1 + $0x110] sm:$0xff] }
  0x2b   :  { %2517 = vmatmul.mubr.f32.gmra.mrb[14].mxu1 %v394_v60  ;;  %2697 = vmatmul.mubr.f32.gmra.mrb[16].mxu0 %v412_v30  ;;  %v453_v60 = vsub.f32 %v3333_v40, %v452_v29  ;;  %v3381_v30 = vsub.f32 %v136_v2, %v3364_v54  ;;  %v44_v2 = vld [vmem:[%s3812_s1 + $0x108] sm:$0xff]  ;;  %v3410_v18 = vsub.f32 %v142_v46, %v3383_v37  ;;  %v47_v46 = vld [vmem:[%s3812_s1 + $0x120] sm:$0xff] }
  0x2c   :  { %2519 = vmatprep.mubr.f32.mxu1 %v404_v48  ;;  %2699 = vmatprep.mubr.f32.mxu0 %v422_v50  ;;  %v41_v48 = vld [vmem:[%s3812_s1 + $0xf0] sm:$0xff]  ;;  %v3390_v50 = vsub.f32 %v139_v47, %v3369_v55  ;;  %v42_v47 = vld [vmem:[%s3812_s1 + $0xf8] sm:$0xff]  ;;  %v483_v56 = vsub.f32 %v3367_v62, %v482_v25 }
  0x2d   :  { %3873 = vst [vmem:[#allocation27_spill] sm:$0xff] %v3381_v30  ;;  %v454_v40 = vand.u32 4294901760, %v453_v60  ;;  %v151_v44 = vsel %vm59_vm0, %v41_v48, 0  ;;  %3875 = vst [vmem:[#allocation29_spill] sm:$0xff] %v3410_v18  ;;  %v43_v60 = vld [vmem:[%s3812_s1 + $0x100] sm:$0xff]  ;;  %v160_v48 = vsel %vm59_vm0, %v44_v2, 0 }
  0x2e   :  { %3874 = vst [vmem:[#allocation28_spill] sm:$0xff] %v3390_v50  ;;  %v502_v41 = vand.u32 4294901760, %v3390_v50  ;;  %v3427_v32 = vand.u32 4294901760, %v151_v44  ;;  %v154_v2 = vsel %vm59_vm0, %v42_v47, 0  ;;  %v157_v62 = vsel %vm59_vm0, %v43_v60, 0 }
  0x2f   :  { %2520 = vmatmul.mubr.f32.gmra.mrb[16].mxu1 %v414_v3  ;;  %2700 = vmatmul.mubr.f32.gmra.mrb[18].mxu0 %v432_v52  ;;  %v473_v3 = vsub.f32 %v3357_v36, %v472_v12  ;;  %v46_v52 = vld [vmem:[%s3812_s1 + $0x118] sm:$0xff]  ;;  %v492_v36 = vand.u32 4294901760, %v3381_v30  ;;  %v512_v21 = vand.u32 4294901760, %v3410_v18  ;;  %v484_v47 = vand.u32 4294901760, %v483_v56 }
  0x30   :  { %2522 = vmatprep.mubr.f32.mxu1 %v424_v58  ;;  %2702 = vmatprep.mubr.f32.mxu0 %v442_v35  ;;  %v464_v58 = vand.u32 4294901760, %v463_v9  ;;  %v3412_v35 = vand.u32 4294901760, %v148_v23  ;;  %v3422_v9 = vsub.f32 %v145_v19, %v3392_v43  ;;  %v166_v28 = vsel %vm59_vm0, %v46_v52, 0  ;;  %v48_v19 = vld [vmem:[%s3812_s1 + $0x128] sm:$0xff] }
  0x31   :  { %v474_v26 = vand.u32 4294901760, %v473_v3  ;;  %v3443_v52 = vand.u32 4294901760, %v154_v2  ;;  %v503_v60 = vsub.f32 %v3390_v50, %v502_v41  ;;  %v3447_v3 = vsub.f32 %v151_v44, %v3427_v32 }
  0x32   :  { %3876 = vst [vmem:[#allocation30_spill] sm:$0xff] %v3422_v9  ;;  %v3449_v20 = vand.u32 4294901760, %v157_v62  ;;  %v513_v56 = vsub.f32 %v3410_v18, %v512_v21 }
  0x33   :  { %2523 = vmatmul.mubr.f32.gmra.mrb[18].mxu1 %v434_v7  ;;  %2703 = vmatmul.mubr.f32.gmra.mrb[20].mxu0 %v452_v29  ;;  %v163_v7 = vsel %vm59_vm0, %v45_v13, 0  ;;  %v169_v29 = vsel %vm59_vm0, %v47_v46, 0  ;;  %v493_v13 = vsub.f32 %v3381_v30, %v492_v36  ;;  %3877 = vst [vmem:[#allocation31_spill] sm:$0xff] %v3447_v3  ;;  %v504_v44 = vand.u32 4294901760, %v503_v60 }
  0x34   :  { %2525 = vmatprep.mubr.f32.mxu1 %v444_v61  ;;  %2705 = vmatprep.mubr.f32.mxu0 %v462_v57  ;;  %v3438_v61 = vsub.f32 %v148_v23, %v3412_v35  ;;  %v522_v57 = vand.u32 4294901760, %v3422_v9  ;;  %v172_v23 = vsel %vm59_vm0, %v48_v19, 0  ;;  %v542_v50 = vand.u32 4294901760, %v3447_v3 }
  0x35   :  { %v494_v46 = vand.u32 4294901760, %v493_v13  ;;  %v3464_v19 = vand.u32 4294901760, %v163_v7  ;;  %v3478_v60 = vand.u32 4294901760, %v169_v29 }
  0x36   :  { %v523_v30 = vsub.f32 %v3422_v9, %v522_v57 }
  0x37   :  { %2526 = vmatmul.mubr.f32.gmra.mrb[20].mxu1 %v454_v40  ;;  %2706 = vmatmul.mubr.f32.gmra.mrb[22].mxu0 %v472_v12  ;;  %v532_v40 = vand.u32 4294901760, %v3438_v61  ;;  %v3456_v12 = vsub.f32 %v154_v2, %v3443_v52 }
  0x38   :  { %2528 = vmatprep.mubr.f32.mxu1 %v464_v58  ;;  %2708 = vmatprep.mubr.f32.mxu0 %v482_v25  ;;  %v3458_v58 = vand.u32 4294901760, %v160_v48  ;;  %v3462_v25 = vsub.f32 %v157_v62, %v3449_v20  ;;  %v524_v9 = vand.u32 4294901760, %v523_v30  ;;  %v543_v62 = vsub.f32 %v3447_v3, %v542_v50 }
  0x39   :  { %3878 = vst [vmem:[#allocation32_spill] sm:$0xff] %v3456_v12  ;;  %v533_v13 = vsub.f32 %v3438_v61, %v532_v40  ;;  %v552_v2 = vand.u32 4294901760, %v3456_v12 }
  0x3a   :  { %v3469_v18 = vsub.f32 %v160_v48, %v3458_v58 }
  0x3b   :  { %2529 = vmatmul.mubr.f32.gmra.mrb[22].mxu1 %v474_v26  ;;  %2709 = vmatmul.mubr.f32.gmra.mrb[24].mxu0 %v492_v36  ;;  %v514_v26 = vand.u32 4294901760, %v513_v56  ;;  %v3471_v36 = vand.u32 4294901760, %v166_v28  ;;  %v534_v30 = vand.u32 4294901760, %v533_v13  ;;  %v553_v56 = vsub.f32 %v3456_v12, %v552_v2 }
  0x3c   :  { %2531 = vmatprep.mubr.f32.mxu1 %v484_v47  ;;  %2711 = vmatprep.mubr.f32.mxu0 %v502_v41  ;;  %v562_v47 = vand.u32 4294901760, %v3462_v25  ;;  %v3476_v41 = vsub.f32 %v163_v7, %v3464_v19  ;;  %v572_v48 = vand.u32 4294901760, %v3469_v18 }
  0x3e   :  { %v563_v7 = vsub.f32 %v3462_v25, %v562_v47  ;;  %v582_v3 = vand.u32 4294901760, %v3476_v41  ;;  %v573_v13 = vsub.f32 %v3469_v18, %v572_v48 }
  0x3f   :  { %2532 = vmatmul.mubr.f32.gmra.mrb[24].mxu1 %v494_v46  ;;  %2712 = vmatmul.mubr.f32.gmra.mrb[26].mxu0 %v512_v21  ;;  %v3483_v46 = vsub.f32 %v166_v28, %v3471_v36  ;;  %v3485_v21 = vand.u32 4294901760, %v172_v23 }
  0x40   :  { %2534 = vmatprep.mubr.f32.mxu1 %v504_v44  ;;  %2714 = vmatprep.mubr.f32.mxu0 %v522_v57  ;;  %v544_v44 = vand.u32 4294901760, %v543_v62  ;;  %v3490_v57 = vsub.f32 %v169_v29, %v3478_v60  ;;  %v574_v29 = vand.u32 4294901760, %v573_v13 }
  0x41   :  { %v592_v28 = vand.u32 4294901760, %v3483_v46  ;;  %v3495_v12 = vsub.f32 %v172_v23, %v3485_v21 }
  0x42   :  { %v602_v62 = vand.u32 4294901760, %v3490_v57 }
  0x43   :  { %2535 = vmatmul.mubr.f32.gmra.mrb[26].mxu1 %v514_v26  ;;  %2715 = vmatmul.mubr.f32.gmra.mrb[28].mxu0 %v532_v40  ;;  %v554_v26 = vand.u32 4294901760, %v553_v56  ;;  %v583_v40 = vsub.f32 %v3476_v41, %v582_v3 }
  0x44   :  { %2537 = vmatprep.mubr.f32.mxu1 %v524_v9  ;;  %2717 = vmatprep.mubr.f32.mxu0 %v542_v50  ;;  %v564_v9 = vand.u32 4294901760, %v563_v7  ;;  %v593_v50 = vsub.f32 %v3483_v46, %v592_v28  ;;  %v603_v23 = vsub.f32 %v3490_v57, %v602_v62 }
  0x45   :  { %v584_v56 = vand.u32 4294901760, %v583_v40 }
  0x46   :  { %v604_v7 = vand.u32 4294901760, %v603_v23 }
  0x47   :  { %2538 = vmatmul.mubr.f32.gmra.mrb[28].mxu1 %v534_v30  ;;  %2718 = vmatmul.mubr.f32.gmra.mrb[30].mxu0 %v552_v2  ;;  %v612_v30 = vand.u32 4294901760, %v3495_v12  ;;  %v594_v2 = vand.u32 4294901760, %v593_v50 }
  0x48   :  { %2540 = vmatprep.mubr.f32.mxu1 %v544_v44  ;;  %2720 = vmatprep.mubr.f32.mxu0 %v562_v47 }
  0x49   :  { %v613_v44 = vsub.f32 %v3495_v12, %v612_v30 }
  0x4b   :  { %2541 = vmatmul.mubr.f32.gmra.mrb[30].mxu1 %v554_v26  ;;  %2721 = vmatmul.mubr.f32.gmra.mrb[32].mxu0 %v572_v48  ;;  %v614_v47 = vand.u32 4294901760, %v613_v44  ;;  %v3882_v48 = vld [vmem:[#allocation4_spill] sm:$0xff]  ;;  %v3883_v26 = vld [vmem:[#allocation5_spill] sm:$0xff] }
  0x4c   :  { %2543 = vmatprep.mubr.f32.mxu1 %v564_v9  ;;  %2723 = vmatprep.mubr.f32.mxu0 %v582_v3  ;;  %v3879_v3 = vmov 1.0  }
  0x4f   :  { %2544 = vmatmul.mubr.f32.gmra.mrb[32].mxu1 %v574_v29  ;;  %2724 = vmatmul.mubr.f32.gmra.mrb[34].mxu0 %v592_v28 }
  0x50   :  { %2546 = vmatprep.mubr.f32.mxu1 %v584_v56  ;;  %2726 = vmatprep.mubr.f32.mxu0 %v602_v62 }
  0x53   :  { %2547 = vmatmul.mubr.f32.gmra.mrb[34].mxu1 %v594_v2  ;;  %2727 = vmatmul.mubr.f32.gmra.mrb[36].mxu0 %v612_v30 }
  0x54   :  { %2549 = vmatprep.mubr.f32.mxu1 %v604_v7  ;;  %2731 = vmatprep.mubr.f32.mxu0 %v3076_v10 }
  0x57   :  { %2550 = vmatmul.mubr.f32.gmra.mrb[36].mxu1 %v614_v47  ;;  %2732 = vmatmul.mubr.f32.vlgmr.msra.gmra.mrb[0].mxu0 %v3078_v11 }
  0x58   :  { %2554 = vmatprep.mubr.f32.mxu1 %v3076_v10  ;;  %2734 = vmatprep.mubr.f32.mxu0 %v3089_v16 }
  0x59   :  { %2789 = vmatpush3.msk.msra.mxu0 %vm3085_vm1, %v3879_v3 }
  0x5b   :  { %2555 = vmatmul.mubr.f32.vlgmr.msra.gmra.mrb[0].mxu1 %v3078_v11  ;;  %2735 = vmatmul.mubr.f32.gmra.mrb[2].mxu0 %v3091_v17 }
  0x5c   :  { %2612 = vmatpush3.msra.mxu1 %v3122_v27  ;;  %2557 = vmatprep.mubr.f32.mxu1 %v3089_v16  ;;  %v3881_v27 = vld [vmem:[#allocation3_spill] sm:$0xff] }
  0x5d   :  { %2737 = vmatprep.mubr.f32.mxu0 %v3108_v24 }
  0x5f   :  { %2558 = vmatmul.mubr.f32.gmra.mrb[2].mxu1 %v3091_v17  ;;  %2738 = vmatmul.mubr.f32.gmra.mrb[4].mxu0 %v3133_v33 }
  0x60   :  { %2560 = vmatprep.mubr.f32.mxu1 %v3108_v24  ;;  %2740 = vmatprep.mubr.f32.mxu0 %v3148_v45 }
  0x63   :  { %2561 = vmatmul.mubr.f32.gmra.mrb[4].mxu1 %v3133_v33  ;;  %2741 = vmatmul.mubr.f32.gmra.mrb[6].mxu0 %v3177_v0 }
  0x64   :  { %2563 = vmatprep.mubr.f32.mxu1 %v3148_v45  ;;  %2743 = vmatprep.mubr.f32.mxu0 %v3179_v1 }
  0x67   :  { %2564 = vmatmul.mubr.f32.gmra.mrb[6].mxu1 %v3177_v0  ;;  %2744 = vmatmul.mubr.f32.gmra.mrb[8].mxu0 %v3188_v6 }
  0x68   :  { %2566 = vmatprep.mubr.f32.mxu1 %v3179_v1  ;;  %2746 = vmatprep.mubr.f32.mxu0 %v3199_v14 }
  0x6b   :  { %2567 = vmatmul.mubr.f32.gmra.mrb[8].mxu1 %v3188_v6  ;;  %2747 = vmatmul.mubr.f32.gmra.mrb[10].mxu0 %v3204_v22 }
  0x6c   :  { %2569 = vmatprep.mubr.f32.mxu1 %v3199_v14  ;;  %2749 = vmatprep.mubr.f32.mxu0 %v3221_v38 }
  0x6f   :  { %2570 = vmatmul.mubr.f32.gmra.mrb[10].mxu1 %v3204_v22  ;;  %2750 = vmatmul.mubr.f32.gmra.mrb[12].mxu0 %v3223_v39 }
  0x70   :  { %2572 = vmatprep.mubr.f32.mxu1 %v3221_v38  ;;  %2752 = vmatprep.mubr.f32.mxu0 %v3243_v53 }
  0x73   :  { %2573 = vmatmul.mubr.f32.gmra.mrb[12].mxu1 %v3223_v39  ;;  %2753 = vmatmul.mubr.f32.gmra.mrb[14].mxu0 %v3260_v4 }
  0x74   :  { %2575 = vmatprep.mubr.f32.mxu1 %v3243_v53  ;;  %2755 = vmatprep.mubr.f32.mxu0 %v3266_v8 }
  0x77   :  { %2576 = vmatmul.mubr.f32.gmra.mrb[14].mxu1 %v3260_v4  ;;  %2756 = vmatmul.mubr.f32.gmra.mrb[16].mxu0 %v3277_v34 }
  0x78   :  { %2578 = vmatprep.mubr.f32.mxu1 %v3266_v8  ;;  %2758 = vmatprep.mubr.f32.mxu0 %v3282_v42 }
  0x7b   :  { %2579 = vmatmul.mubr.f32.gmra.mrb[16].mxu1 %v3277_v34  ;;  %2759 = vmatmul.mubr.f32.gmra.mrb[18].mxu0 %v3289_v51 }
  0x7c   :  { %2581 = vmatprep.mubr.f32.mxu1 %v3282_v42  ;;  %2761 = vmatprep.mubr.f32.mxu0 %v3304_v63 }
  0x7f   :  { %2582 = vmatmul.mubr.f32.gmra.mrb[18].mxu1 %v3289_v51  ;;  %2762 = vmatmul.mubr.f32.gmra.mrb[20].mxu0 %v3307_v5 }
  0x80   :  { %2584 = vmatprep.mubr.f32.mxu1 %v3304_v63  ;;  %2764 = vmatprep.mubr.f32.mxu0 %v3326_v59 }
  0x83   :  { %2585 = vmatmul.mubr.f32.gmra.mrb[20].mxu1 %v3307_v5  ;;  %2765 = vmatmul.mubr.f32.gmra.mrb[22].mxu0 %v3335_v31 }
  0x84   :  { %2587 = vmatprep.mubr.f32.mxu1 %v3326_v59  ;;  %2767 = vmatprep.mubr.f32.mxu0 %v3346_v49 }
  0x87   :  { %2588 = vmatmul.mubr.f32.gmra.mrb[22].mxu1 %v3335_v31  ;;  %2768 = vmatmul.mubr.f32.gmra.mrb[24].mxu0 %v3364_v54 }
  0x88   :  { %2590 = vmatprep.mubr.f32.mxu1 %v3346_v49  ;;  %2770 = vmatprep.mubr.f32.mxu0 %v3369_v55 }
  0x8b   :  { %2591 = vmatmul.mubr.f32.gmra.mrb[24].mxu1 %v3364_v54  ;;  %2771 = vmatmul.mubr.f32.gmra.mrb[26].mxu0 %v3383_v37 }
  0x8c   :  { %2593 = vmatprep.mubr.f32.mxu1 %v3369_v55  ;;  %2773 = vmatprep.mubr.f32.mxu0 %v3392_v43 }
  0x8f   :  { %2594 = vmatmul.mubr.f32.gmra.mrb[26].mxu1 %v3383_v37  ;;  %2774 = vmatmul.mubr.f32.gmra.mrb[28].mxu0 %v3412_v35 }
  0x90   :  { %2596 = vmatprep.mubr.f32.mxu1 %v3392_v43  ;;  %2776 = vmatprep.mubr.f32.mxu0 %v3427_v32 }
  0x93   :  { %2597 = vmatmul.mubr.f32.gmra.mrb[28].mxu1 %v3412_v35  ;;  %2777 = vmatmul.mubr.f32.gmra.mrb[30].mxu0 %v3443_v52 }
  0x94   :  { %2599 = vmatprep.mubr.f32.mxu1 %v3427_v32  ;;  %2779 = vmatprep.mubr.f32.mxu0 %v3449_v20 }
  0x97   :  { %2600 = vmatmul.mubr.f32.gmra.mrb[30].mxu1 %v3443_v52  ;;  %2780 = vmatmul.mubr.f32.gmra.mrb[32].mxu0 %v3458_v58 }
  0x98   :  { %2602 = vmatprep.mubr.f32.mxu1 %v3449_v20  ;;  %2782 = vmatprep.mubr.f32.mxu0 %v3464_v19 }
  0x9b   :  { %2603 = vmatmul.mubr.f32.gmra.mrb[32].mxu1 %v3458_v58  ;;  %2783 = vmatmul.mubr.f32.gmra.mrb[34].mxu0 %v3471_v36 }
  0x9c   :  { %2605 = vmatprep.mubr.f32.mxu1 %v3464_v19  ;;  %2785 = vmatprep.mubr.f32.mxu0 %v3478_v60 }
  0x9f   :  { %2606 = vmatmul.mubr.f32.gmra.mrb[34].mxu1 %v3471_v36  ;;  %2786 = vmatmul.mubr.f32.gmra.mrb[36].mxu0 %v3485_v21 }
  0xa0   :  { %2608 = vmatprep.mubr.f32.mxu1 %v3478_v60  ;;  %2790 = vmatprep.mubr.f32.mxu0 %v3076_v10  ;;  %v3884_v10 = vld [vmem:[#allocation6_spill] sm:$0xff] }
  0xa3   :  { %2609 = vmatmul.mubr.f32.gmra.mrb[36].mxu1 %v3485_v21  ;;  %2791 = vmatmul.mubr.f32.vlgmr.msra.gmra.mrb[0].mxu0 %v3078_v11  ;;  %v3885_v11 = vld [vmem:[#allocation7_spill] sm:$0xff] }
  0xa4   :  { %2613 = vmatprep.mubr.f32.mxu1 %v3880_v15  ;;  %2793 = vmatprep.mubr.f32.mxu0 %v3089_v16  ;;  %v3886_v16 = vld [vmem:[#allocation8_spill] sm:$0xff] }
  0xa7   :  { %2614 = vmatmul.mubr.f32.vlgmr.msra.gmra.mrb[0].mxu1 %v3881_v27  ;;  %2794 = vmatmul.mubr.f32.gmra.mrb[2].mxu0 %v3091_v17  ;;  %v3887_v17 = vld [vmem:[#allocation9_spill] sm:$0xff] }
  0xa8   :  { %2616 = vmatprep.mubr.f32.mxu1 %v3882_v48  ;;  %2796 = vmatprep.mubr.f32.mxu0 %v3108_v24  ;;  %v3888_v24 = vld [vmem:[#allocation10_spill] sm:$0xff] }
  0xab   :  { %2617 = vmatmul.mubr.f32.gmra.mrb[2].mxu1 %v3883_v26  ;;  %2797 = vmatmul.mubr.f32.gmra.mrb[4].mxu0 %v3133_v33  ;;  %v3889_v33 = vld [vmem:[#allocation11_spill] sm:$0xff] }
  0xac   :  { %2619 = vmatprep.mubr.f32.mxu1 %v3884_v10  ;;  %2799 = vmatprep.mubr.f32.mxu0 %v3148_v45  ;;  %v3890_v45 = vld [vmem:[#allocation12_spill] sm:$0xff] }
  0xaf   :  { %2620 = vmatmul.mubr.f32.gmra.mrb[4].mxu1 %v3885_v11  ;;  %2800 = vmatmul.mubr.f32.gmra.mrb[6].mxu0 %v3177_v0  ;;  %v3891_v0 = vld [vmem:[#allocation13_spill] sm:$0xff] }
  0xb0   :  { %2622 = vmatprep.mubr.f32.mxu1 %v3886_v16  ;;  %2802 = vmatprep.mubr.f32.mxu0 %v3179_v1  ;;  %v3892_v1 = vld [vmem:[#allocation14_spill] sm:$0xff] }
  0xb3   :  { %2623 = vmatmul.mubr.f32.gmra.mrb[6].mxu1 %v3887_v17  ;;  %2803 = vmatmul.mubr.f32.gmra.mrb[8].mxu0 %v3188_v6  ;;  %v3893_v6 = vld [vmem:[#allocation15_spill] sm:$0xff] }
  0xb4   :  { %2625 = vmatprep.mubr.f32.mxu1 %v3888_v24  ;;  %2805 = vmatprep.mubr.f32.mxu0 %v3199_v14  ;;  %v3894_v14 = vld [vmem:[#allocation16_spill] sm:$0xff] }
  0xb7   :  { %2626 = vmatmul.mubr.f32.gmra.mrb[8].mxu1 %v3889_v33  ;;  %2806 = vmatmul.mubr.f32.gmra.mrb[10].mxu0 %v3204_v22  ;;  %v3895_v22 = vld [vmem:[#allocation17_spill] sm:$0xff] }
  0xb8   :  { %2628 = vmatprep.mubr.f32.mxu1 %v3890_v45  ;;  %2808 = vmatprep.mubr.f32.mxu0 %v3221_v38  ;;  %v3896_v38 = vld [vmem:[#allocation18_spill] sm:$0xff] }
  0xbb   :  { %2629 = vmatmul.mubr.f32.gmra.mrb[10].mxu1 %v3891_v0  ;;  %2809 = vmatmul.mubr.f32.gmra.mrb[12].mxu0 %v3223_v39  ;;  %v3897_v39 = vld [vmem:[#allocation19_spill] sm:$0xff] }
  0xbc   :  { %2631 = vmatprep.mubr.f32.mxu1 %v3892_v1  ;;  %2811 = vmatprep.mubr.f32.mxu0 %v3243_v53  ;;  %v3898_v53 = vld [vmem:[#allocation20_spill] sm:$0xff] }
  0xbf   :  { %2632 = vmatmul.mubr.f32.gmra.mrb[12].mxu1 %v3893_v6  ;;  %2812 = vmatmul.mubr.f32.gmra.mrb[14].mxu0 %v3260_v4  ;;  %v3899_v4 = vld [vmem:[#allocation21_spill] sm:$0xff] }
  0xc0   :  { %2634 = vmatprep.mubr.f32.mxu1 %v3894_v14  ;;  %2814 = vmatprep.mubr.f32.mxu0 %v3266_v8  ;;  %v3900_v8 = vld [vmem:[#allocation22_spill] sm:$0xff] }
  0xc3   :  { %2635 = vmatmul.mubr.f32.gmra.mrb[14].mxu1 %v3895_v22  ;;  %2815 = vmatmul.mubr.f32.gmra.mrb[16].mxu0 %v3277_v34  ;;  %v3901_v34 = vld [vmem:[#allocation23_spill] sm:$0xff] }
  0xc4   :  { %2637 = vmatprep.mubr.f32.mxu1 %v3896_v38  ;;  %2817 = vmatprep.mubr.f32.mxu0 %v3282_v42  ;;  %v3902_v42 = vld [vmem:[#allocation24_spill] sm:$0xff] }
  0xc7   :  { %2638 = vmatmul.mubr.f32.gmra.mrb[16].mxu1 %v3897_v39  ;;  %2818 = vmatmul.mubr.f32.gmra.mrb[18].mxu0 %v3289_v51  ;;  %v3903_v51 = vld [vmem:[#allocation25_spill] sm:$0xff] }
  0xc8   :  { %2640 = vmatprep.mubr.f32.mxu1 %v3898_v53  ;;  %2820 = vmatprep.mubr.f32.mxu0 %v3304_v63  ;;  %v3904_v63 = vld [vmem:[#allocation26_spill] sm:$0xff] }
  0xcb   :  { %2641 = vmatmul.mubr.f32.gmra.mrb[18].mxu1 %v3899_v4  ;;  %2821 = vmatmul.mubr.f32.gmra.mrb[20].mxu0 %v3307_v5  ;;  %v3905_v5 = vld [vmem:[#allocation27_spill] sm:$0xff] }
  0xcc   :  { %2643 = vmatprep.mubr.f32.mxu1 %v3900_v8  ;;  %2823 = vmatprep.mubr.f32.mxu0 %v3326_v59  ;;  %v3906_v59 = vld [vmem:[#allocation28_spill] sm:$0xff] }
  0xcf   :  { %2644 = vmatmul.mubr.f32.gmra.mrb[20].mxu1 %v3901_v34  ;;  %2824 = vmatmul.mubr.f32.gmra.mrb[22].mxu0 %v3335_v31  ;;  %v3907_v31 = vld [vmem:[#allocation29_spill] sm:$0xff] }
  0xd0   :  { %2646 = vmatprep.mubr.f32.mxu1 %v3902_v42  ;;  %2826 = vmatprep.mubr.f32.mxu0 %v3346_v49  ;;  %v3908_v49 = vld [vmem:[#allocation30_spill] sm:$0xff] }
  0xd3   :  { %2647 = vmatmul.mubr.f32.gmra.mrb[22].mxu1 %v3903_v51  ;;  %2827 = vmatmul.mubr.f32.gmra.mrb[24].mxu0 %v3364_v54  ;;  %v3909_v54 = vld [vmem:[#allocation31_spill] sm:$0xff] }
  0xd4   :  { %2649 = vmatprep.mubr.f32.mxu1 %v3904_v63  ;;  %2829 = vmatprep.mubr.f32.mxu0 %v3369_v55  ;;  %v3910_v55 = vld [vmem:[#allocation32_spill] sm:$0xff] }
  0xd7   :  { %2650 = vmatmul.mubr.f32.gmra.mrb[24].mxu1 %v3905_v5  ;;  %2830 = vmatmul.mubr.f32.gmra.mrb[26].mxu0 %v3383_v37 }
  0xd8   :  { %2652 = vmatprep.mubr.f32.mxu1 %v3906_v59  ;;  %2832 = vmatprep.mubr.f32.mxu0 %v3392_v43 }
  0xdb   :  { %2653 = vmatmul.mubr.f32.gmra.mrb[26].mxu1 %v3907_v31  ;;  %2833 = vmatmul.mubr.f32.gmra.mrb[28].mxu0 %v3412_v35 }
  0xdc   :  { %2655 = vmatprep.mubr.f32.mxu1 %v3908_v49  ;;  %2835 = vmatprep.mubr.f32.mxu0 %v3427_v32 }
  0xdf   :  { %2656 = vmatmul.mubr.f32.gmra.mrb[28].mxu1 %v3438_v61  ;;  %2836 = vmatmul.mubr.f32.gmra.mrb[30].mxu0 %v3443_v52 }
  0xe0   :  { %2658 = vmatprep.mubr.f32.mxu1 %v3909_v54  ;;  %2838 = vmatprep.mubr.f32.mxu0 %v3449_v20 }
  0xe3   :  { %2659 = vmatmul.mubr.f32.gmra.mrb[30].mxu1 %v3910_v55  ;;  %2839 = vmatmul.mubr.f32.gmra.mrb[32].mxu0 %v3458_v58 }
  0xe4   :  { %2661 = vmatprep.mubr.f32.mxu1 %v3462_v25  ;;  %2841 = vmatprep.mubr.f32.mxu0 %v3464_v19 }
  0xe7   :  { %2662 = vmatmul.mubr.f32.gmra.mrb[32].mxu1 %v3469_v18  ;;  %2842 = vmatmul.mubr.f32.gmra.mrb[34].mxu0 %v3471_v36 }
  0xe8   :  { %2664 = vmatprep.mubr.f32.mxu1 %v3476_v41  ;;  %2844 = vmatprep.mubr.f32.mxu0 %v3478_v60 }
  0xeb   :  { %2665 = vmatmul.mubr.f32.gmra.mrb[34].mxu1 %v3483_v46  ;;  %2845 = vmatmul.mubr.f32.gmra.mrb[36].mxu0 %v3485_v21 }
  0xec   :  { %2667 = vmatprep.mubr.f32.mxu1 %v3490_v57 }
  0xef   :  { %2668 = vmatmul.mubr.f32.gmra.mrb[36].mxu1 %v3495_v12 }
 0x176   :  { %v2792_v20 = vpop.f32.mrb[0].mxu0 }
 0x177   :  { %v1985_v32 = vpop.f32.mrb[1].mxu0 }
 0x17a   :  { %v2615_v37 = vpop.f32.mrb[0].mxu1  ;;  %v2795_v18 = vpop.f32.mrb[2].mxu0 }
 0x17b   :  { %v2847_v43 = vadd.f32 %v2792_v20, %v2615_v37  ;;  %v988_v35 = vpop.f32.mrb[1].mxu1  ;;  %v1997_v52 = vpop.f32.mrb[3].mxu0 }
 0x17c   :  { %v2848_v61 = vadd.f32 %v1985_v32, %v988_v35 }
 0x17d   :  { %2213 = vst.msk [vmem:[%s3813_s2 + $0x8] sm:$0xff] %vm2211_vm2, %v2847_v43 }
 0x17e   :  { %2212 = vst.msk [vmem:[%s3813_s2] sm:$0xff] %vm2211_vm2, %v2848_v61  ;;  %v2618_v12 = vpop.f32.mrb[2].mxu1  ;;  %v2798_v25 = vpop.f32.mrb[4].mxu0 }
 0x17f   :  { %v2849_v58 = vadd.f32 %v2795_v18, %v2618_v12  ;;  %v1002_v19 = vpop.f32.mrb[3].mxu1  ;;  %v2009_v41 = vpop.f32.mrb[5].mxu0 }
 0x180   :  { %v2850_v36 = vadd.f32 %v1997_v52, %v1002_v19 }
 0x181   :  { %2215 = vst.msk [vmem:[%s3813_s2 + $0x18] sm:$0xff] %vm2211_vm2, %v2849_v58 }
 0x182   :  { %2214 = vst.msk [vmem:[%s3813_s2 + $0x10] sm:$0xff] %vm2211_vm2, %v2850_v36  ;;  %v2621_v60 = vpop.f32.mrb[4].mxu1  ;;  %v2801_v21 = vpop.f32.mrb[6].mxu0 }
 0x183   :  { %v2851_v46 = vadd.f32 %v2798_v25, %v2621_v60  ;;  %v1016_v57 = vpop.f32.mrb[5].mxu1  ;;  %v2021_v28 = vpop.f32.mrb[7].mxu0 }
 0x184   :  { %v2852_v13 = vadd.f32 %v2009_v41, %v1016_v57 }
 0x185   :  { %2217 = vst.msk [vmem:[%s3813_s2 + $0x28] sm:$0xff] %vm2211_vm2, %v2851_v46 }
 0x186   :  { %2216 = vst.msk [vmem:[%s3813_s2 + $0x20] sm:$0xff] %vm2211_vm2, %v2852_v13  ;;  %v2624_v9 = vpop.f32.mrb[6].mxu1  ;;  %v2804_v62 = vpop.f32.mrb[8].mxu0 }
 0x187   :  { %v2853_v40 = vadd.f32 %v2801_v21, %v2624_v9  ;;  %v1030_v29 = vpop.f32.mrb[7].mxu1  ;;  %v2033_v30 = vpop.f32.mrb[9].mxu0 }
 0x188   :  { %v2854_v50 = vadd.f32 %v2021_v28, %v1030_v29 }
 0x189   :  { %2219 = vst.msk [vmem:[%s3813_s2 + $0x38] sm:$0xff] %vm2211_vm2, %v2853_v40 }
 0x18a   :  { %2218 = vst.msk [vmem:[%s3813_s2 + $0x30] sm:$0xff] %vm2211_vm2, %v2854_v50  ;;  %v2627_v56 = vpop.f32.mrb[8].mxu1  ;;  %v2807_v2 = vpop.f32.mrb[10].mxu0 }
 0x18b   :  { %v2855_v23 = vadd.f32 %v2804_v62, %v2627_v56  ;;  %v1044_v44 = vpop.f32.mrb[9].mxu1  ;;  %v2045_v47 = vpop.f32.mrb[11].mxu0 }
 0x18c   :  { %v2856_v7 = vadd.f32 %v2033_v30, %v1044_v44 }
 0x18d   :  { %2221 = vst.msk [vmem:[%s3813_s2 + $0x48] sm:$0xff] %vm2211_vm2, %v2855_v23 }
 0x18e   :  { %2220 = vst.msk [vmem:[%s3813_s2 + $0x40] sm:$0xff] %vm2211_vm2, %v2856_v7  ;;  %v2630_v3 = vpop.f32.mrb[10].mxu1  ;;  %v2810_v27 = vpop.f32.mrb[12].mxu0 }
 0x18f   :  { %v2857_v15 = vadd.f32 %v2807_v2, %v2630_v3  ;;  %v1058_v48 = vpop.f32.mrb[11].mxu1  ;;  %v2057_v10 = vpop.f32.mrb[13].mxu0 }
 0x190   :  { %v2858_v26 = vadd.f32 %v2045_v47, %v1058_v48 }
 0x191   :  { %2223 = vst.msk [vmem:[%s3813_s2 + $0x58] sm:$0xff] %vm2211_vm2, %v2857_v15 }
 0x192   :  { %2222 = vst.msk [vmem:[%s3813_s2 + $0x50] sm:$0xff] %vm2211_vm2, %v2858_v26  ;;  %v2633_v11 = vpop.f32.mrb[12].mxu1  ;;  %v2813_v17 = vpop.f32.mrb[14].mxu0 }
 0x193   :  { %v2859_v16 = vadd.f32 %v2810_v27, %v2633_v11  ;;  %v1072_v24 = vpop.f32.mrb[13].mxu1  ;;  %v2069_v45 = vpop.f32.mrb[15].mxu0 }
 0x194   :  { %v2860_v33 = vadd.f32 %v2057_v10, %v1072_v24 }
 0x195   :  { %2225 = vst.msk [vmem:[%s3813_s2 + $0x68] sm:$0xff] %vm2211_vm2, %v2859_v16 }
 0x196   :  { %2224 = vst.msk [vmem:[%s3813_s2 + $0x60] sm:$0xff] %vm2211_vm2, %v2860_v33  ;;  %v2636_v0 = vpop.f32.mrb[14].mxu1  ;;  %v2816_v6 = vpop.f32.mrb[16].mxu0 }
 0x197   :  { %v2861_v1 = vadd.f32 %v2813_v17, %v2636_v0  ;;  %v1086_v14 = vpop.f32.mrb[15].mxu1  ;;  %v2081_v38 = vpop.f32.mrb[17].mxu0 }
 0x198   :  { %v2862_v22 = vadd.f32 %v2069_v45, %v1086_v14 }
 0x199   :  { %2227 = vst.msk [vmem:[%s3813_s2 + $0x78] sm:$0xff] %vm2211_vm2, %v2861_v1 }
 0x19a   :  { %2226 = vst.msk [vmem:[%s3813_s2 + $0x70] sm:$0xff] %vm2211_vm2, %v2862_v22  ;;  %v2639_v39 = vpop.f32.mrb[16].mxu1  ;;  %v2819_v4 = vpop.f32.mrb[18].mxu0 }
 0x19b   :  { %v2863_v53 = vadd.f32 %v2816_v6, %v2639_v39  ;;  %v1100_v8 = vpop.f32.mrb[17].mxu1  ;;  %v2093_v42 = vpop.f32.mrb[19].mxu0 }
 0x19c   :  { %v2864_v34 = vadd.f32 %v2081_v38, %v1100_v8 }
 0x19d   :  { %2229 = vst.msk [vmem:[%s3813_s2 + $0x88] sm:$0xff] %vm2211_vm2, %v2863_v53 }
 0x19e   :  { %2228 = vst.msk [vmem:[%s3813_s2 + $0x80] sm:$0xff] %vm2211_vm2, %v2864_v34  ;;  %v2642_v51 = vpop.f32.mrb[18].mxu1  ;;  %v2822_v5 = vpop.f32.mrb[20].mxu0 }
 0x19f   :  { %v2865_v63 = vadd.f32 %v2819_v4, %v2642_v51  ;;  %v1114_v59 = vpop.f32.mrb[19].mxu1  ;;  %v2105_v49 = vpop.f32.mrb[21].mxu0 }
 0x1a0   :  { %v2866_v31 = vadd.f32 %v2093_v42, %v1114_v59 }
 0x1a1   :  { %2231 = vst.msk [vmem:[%s3813_s2 + $0x98] sm:$0xff] %vm2211_vm2, %v2865_v63 }
 0x1a2   :  { %2230 = vst.msk [vmem:[%s3813_s2 + $0x90] sm:$0xff] %vm2211_vm2, %v2866_v31  ;;  %v2645_v54 = vpop.f32.mrb[20].mxu1  ;;  %v2825_v20 = vpop.f32.mrb[22].mxu0 }
 0x1a3   :  { %v2867_v55 = vadd.f32 %v2822_v5, %v2645_v54  ;;  %v1128_v32 = vpop.f32.mrb[21].mxu1  ;;  %v2117_v43 = vpop.f32.mrb[23].mxu0 }
 0x1a4   :  { %v2868_v37 = vadd.f32 %v2105_v49, %v1128_v32 }
 0x1a5   :  { %2233 = vst.msk [vmem:[%s3813_s2 + $0xa8] sm:$0xff] %vm2211_vm2, %v2867_v55 }
 0x1a6   :  { %2232 = vst.msk [vmem:[%s3813_s2 + $0xa0] sm:$0xff] %vm2211_vm2, %v2868_v37  ;;  %v2648_v18 = vpop.f32.mrb[22].mxu1  ;;  %v2828_v61 = vpop.f32.mrb[24].mxu0 }
 0x1a7   :  { %v2869_v35 = vadd.f32 %v2825_v20, %v2648_v18  ;;  %v1142_v52 = vpop.f32.mrb[23].mxu1  ;;  %v2129_v58 = vpop.f32.mrb[25].mxu0 }
 0x1a8   :  { %v2870_v12 = vadd.f32 %v2117_v43, %v1142_v52 }
 0x1a9   :  { %2235 = vst.msk [vmem:[%s3813_s2 + $0xb8] sm:$0xff] %vm2211_vm2, %v2869_v35 }
 0x1aa   :  { %2234 = vst.msk [vmem:[%s3813_s2 + $0xb0] sm:$0xff] %vm2211_vm2, %v2870_v12  ;;  %v2651_v25 = vpop.f32.mrb[24].mxu1  ;;  %v2831_v36 = vpop.f32.mrb[26].mxu0 }
 0x1ab   :  { %v2871_v19 = vadd.f32 %v2828_v61, %v2651_v25  ;;  %v1156_v41 = vpop.f32.mrb[25].mxu1  ;;  %v2141_v46 = vpop.f32.mrb[27].mxu0 }
 0x1ac   :  { %v2872_v60 = vadd.f32 %v2129_v58, %v1156_v41 }
 0x1ad   :  { %2237 = vst.msk [vmem:[%s3813_s2 + $0xc8] sm:$0xff] %vm2211_vm2, %v2871_v19 }
 0x1ae   :  { %2236 = vst.msk [vmem:[%s3813_s2 + $0xc0] sm:$0xff] %vm2211_vm2, %v2872_v60  ;;  %v2654_v21 = vpop.f32.mrb[26].mxu1  ;;  %v2834_v13 = vpop.f32.mrb[28].mxu0 }
 0x1af   :  { %v2873_v57 = vadd.f32 %v2831_v36, %v2654_v21  ;;  %v1170_v28 = vpop.f32.mrb[27].mxu1  ;;  %v2153_v40 = vpop.f32.mrb[29].mxu0 }
 0x1b0   :  { %v2874_v9 = vadd.f32 %v2141_v46, %v1170_v28 }
 0x1b1   :  { %2239 = vst.msk [vmem:[%s3813_s2 + $0xd8] sm:$0xff] %vm2211_vm2, %v2873_v57 }
 0x1b2   :  { %2238 = vst.msk [vmem:[%s3813_s2 + $0xd0] sm:$0xff] %vm2211_vm2, %v2874_v9  ;;  %v2657_v62 = vpop.f32.mrb[28].mxu1  ;;  %v2837_v50 = vpop.f32.mrb[30].mxu0 }
 0x1b3   :  { %v2875_v29 = vadd.f32 %v2834_v13, %v2657_v62  ;;  %v1184_v30 = vpop.f32.mrb[29].mxu1  ;;  %v2165_v23 = vpop.f32.mrb[31].mxu0 }
 0x1b4   :  { %v2876_v56 = vadd.f32 %v2153_v40, %v1184_v30 }
 0x1b5   :  { %2241 = vst.msk [vmem:[%s3813_s2 + $0xe8] sm:$0xff] %vm2211_vm2, %v2875_v29 }
 0x1b6   :  { %2240 = vst.msk [vmem:[%s3813_s2 + $0xe0] sm:$0xff] %vm2211_vm2, %v2876_v56  ;;  %v2660_v2 = vpop.f32.mrb[30].mxu1  ;;  %v2840_v7 = vpop.f32.mrb[32].mxu0 }
 0x1b7   :  { %v2877_v44 = vadd.f32 %v2837_v50, %v2660_v2  ;;  %v1198_v47 = vpop.f32.mrb[31].mxu1  ;;  %v2177_v15 = vpop.f32.mrb[33].mxu0 }
 0x1b8   :  { %v2878_v3 = vadd.f32 %v2165_v23, %v1198_v47 }
 0x1b9   :  { %2243 = vst.msk [vmem:[%s3813_s2 + $0xf8] sm:$0xff] %vm2211_vm2, %v2877_v44 }
 0x1ba   :  { %2242 = vst.msk [vmem:[%s3813_s2 + $0xf0] sm:$0xff] %vm2211_vm2, %v2878_v3  ;;  %v2663_v27 = vpop.f32.mrb[32].mxu1  ;;  %v2843_v26 = vpop.f32.mrb[34].mxu0 }
 0x1bb   :  { %v2879_v48 = vadd.f32 %v2840_v7, %v2663_v27  ;;  %v1212_v10 = vpop.f32.mrb[33].mxu1  ;;  %v2189_v16 = vpop.f32.mrb[35].mxu0 }
 0x1bc   :  { %v2880_v11 = vadd.f32 %v2177_v15, %v1212_v10 }
 0x1bd   :  { %2245 = vst.msk [vmem:[%s3813_s2 + $0x108] sm:$0xff] %vm2211_vm2, %v2879_v48 }
 0x1be   :  { %2244 = vst.msk [vmem:[%s3813_s2 + $0x100] sm:$0xff] %vm2211_vm2, %v2880_v11  ;;  %v2666_v17 = vpop.f32.mrb[34].mxu1  ;;  %v2846_v33 = vpop.f32.mrb[36].mxu0 }
 0x1bf   :  { %v2881_v24 = vadd.f32 %v2843_v26, %v2666_v17  ;;  %v1226_v45 = vpop.f32.mrb[35].mxu1  ;;  %v2201_v1 = vpop.f32.mrb[37].mxu0 }
 0x1c0   :  { %v2882_v0 = vadd.f32 %v2189_v16, %v1226_v45 }
 0x1c1   :  { %2247 = vst.msk [vmem:[%s3813_s2 + $0x118] sm:$0xff] %vm2211_vm2, %v2881_v24 }
 0x1c2   :  { %2246 = vst.msk [vmem:[%s3813_s2 + $0x110] sm:$0xff] %vm2211_vm2, %v2882_v0  ;;  %v2669_v6 = vpop.f32.mrb[36].mxu1 }
 0x1c3   :  { %v2883_v14 = vadd.f32 %v2846_v33, %v2669_v6  ;;  %v1240_v22 = vpop.f32.mrb[37].mxu1 }
 0x1c4   :  { %v2884_v38 = vadd.f32 %v2201_v1, %v1240_v22 }
 0x1c5   :  { %2249 = vst.msk [vmem:[%s3813_s2 + $0x128] sm:$0xff] %vm2211_vm2, %v2883_v14 }
 0x1c6   :  { %2248 = vst.msk [vmem:[%s3813_s2 + $0x120] sm:$0xff] %vm2211_vm2, %v2884_v38 }

</bundles_post_ra>
